<compile_context>
chip_gen: v5e
topology: v5e:2x2
jax: 0.10.0
libtpu: 0.0.40
codegen_flags: <defaults>
</compile_context>

<pallas_src>
import functools

import jax
import jax.numpy as jnp
from jax.experimental import pallas as pl
from jax.experimental.pallas import tpu as pltpu


# --------------------------------------------------------------------------
# Flash-attention style Pallas kernel.
#   q_ref: (G, tq, d_k)  k_ref: (G, tk, d_k)  v_ref: (G, tk, d_v)   [compute dtype]
#   o_ref: (G, tq, d_v)  [f32]
#   scratch: m (G,tq,1), l (G,tq,1), acc (G,tq,d_v)   [f32]
# Q arrives pre-scaled by 1/sqrt(d_k) (folded into the projection weights).
# --------------------------------------------------------------------------
def _flash_sdpa_kernel(q_ref, k_ref, v_ref, o_ref, m_ref, l_ref, acc_ref,
                       *, exp_dtype):
    ki = pl.program_id(2)

    @pl.when(ki == 0)
    def _init():
        m_ref[...] = jnp.full_like(m_ref, -jnp.inf)
        l_ref[...] = jnp.zeros_like(l_ref)
        acc_ref[...] = jnp.zeros_like(acc_ref)

    # Scores: contraction on the last axes of Q and K (no K transpose in HBM).
    # TODO(synk): verify via bundle dump that this lowers without a per-step
    # vxpose of the K tile; if one appears, feed K as (G, d_k, nk) instead.
    s = jnp.einsum("gqd,gkd->gqk", q_ref[...], k_ref[...],
                   preferred_element_type=jnp.float32)

    # Online (numerically stable) softmax update; stats stay f32.
    m_prev = m_ref[...]
    m_new = jnp.maximum(m_prev, jnp.max(s, axis=-1, keepdims=True))
    alpha = jnp.exp(m_prev - m_new)
    # exp on the EUP; bf16 element rate where supported (v6e/v7x), f32 on v5e.
    p = jnp.exp((s - m_new).astype(exp_dtype))

    l_ref[...] = alpha * l_ref[...] + jnp.sum(
        p.astype(jnp.float32), axis=-1, keepdims=True)
    acc_ref[...] = alpha * acc_ref[...] + jnp.einsum(
        "gqk,gkd->gqd", p.astype(v_ref.dtype), v_ref[...],
        preferred_element_type=jnp.float32)
    m_ref[...] = m_new

    @pl.when(ki == pl.num_programs(2) - 1)
    def _finalize():
        inv_l = pl.reciprocal(l_ref[...], approx=True)   # EUP slot; VALU stays free
        o_ref[...] = (acc_ref[...] * inv_l).astype(o_ref.dtype)


# --------------------------------------------------------------------------
# Tiling / sizing helpers.
# --------------------------------------------------------------------------
def _pick_tile(n, target, aligns=(16, 8)):
    """Largest tile <= target dividing n, preferring 16-alignment (bf16 packing)."""
    if n <= target:
        return n
    for a in aligns:
        if n % a != 0:
            continue
        t = (target // a) * a
        while t >= a:
            if n % t == 0:
                return t
            t -= a
    # TODO(synk): ragged n (not a multiple of 8) — pad sequences in the wrapper
    # for long odd lengths instead of using the full extent as one block.
    return n


def _shrink_tile(n, t, aligns=(16, 8)):
    """Next smaller divisor of n below t (aligned), or t if none."""
    for a in aligns:
        if n % a != 0 or t % a != 0:
            continue
        cand = t - a
        while cand >= a:
            if n % cand == 0:
                return cand
            cand -= a
    return t


def _pick_group(bh, target=8):
    """Largest divisor of bh <= target that leaves the leading grid axis >= 2
    (so v7x's second TensorCore has work to shard)."""
    cap = max(1, min(bh, target))
    for g in range(cap, 0, -1):
        if bh % g == 0 and (bh < 2 or bh // g >= 2):
            return g
    return 1


def _next_smaller_divisor(n, g):
    for cand in range(g - 1, 0, -1):
        if n % cand == 0:
            return cand
    return g


def _device_kind():
    try:
        return jax.devices()[0].device_kind.lower()
    except Exception:
        return ""


def _vmem_budget_bytes():
    """~75% of per-core VMEM: ~48 MiB on v7x, ~96 MiB on v5e/v6e; 48 MiB fallback."""
    try:
        cap = int(pltpu.get_tpu_info().vmem_capacity_bytes)
    except Exception:
        cap = 64 * 1024 * 1024
    return max(16 * 1024 * 1024, int(cap * 0.75))


# --------------------------------------------------------------------------
# pallas_call wrapper (attention core only).
# --------------------------------------------------------------------------
def _sdpa_core(q_bh, k_bh, v_bh):
    """q_bh: (BH, nq, d_k)  k_bh: (BH, nk, d_k)  v_bh: (BH, nk, d_v) -> (BH, nq, d_v) f32.

    Q must already be scaled by 1/sqrt(d_k); Q/K/V already in the compute dtype.
    """
    BH, nq, dk = q_bh.shape
    _, nk, _ = k_bh.shape
    d_v = v_bh.shape[-1]
    in_elem = jnp.dtype(q_bh.dtype).itemsize
    out_elem = 4   # f32 output

    kind = _device_kind()
    is_pre_v6 = ("v5" in kind) or ("v4" in kind) or ("v3" in kind)
    budget = _vmem_budget_bytes()

    G = _pick_group(BH, 8)                       # (batch*head) slices per grid step
    tq = _pick_tile(nq, 256)                     # q tile (resident across kv axis)
    tk = _pick_tile(nk, 256 if is_pre_v6 else 512)  # kv tile (innermost reduction)

    def usage(g, tq_, tk_):
        blocks = 2 * g * (tq_ * dk + tk_ * dk + tk_ * d_v) * in_elem  # dbl-buffered in
        out_blk = 2 * g * tq_ * d_v * out_elem
        scratch = g * tq_ * (2 + d_v) * 4
        temps = 2 * g * tq_ * tk_ * 4             # f32 s / p intermediates
        return blocks + out_blk + scratch + temps

    for _ in range(64):                           # shrink until the budget fits
        if usage(G, tq, tk) <= budget:
            break
        new_tk = _shrink_tile(nk, tk)
        if new_tk < tk:
            tk = new_tk
            continue
        new_tq = _shrink_tile(nq, tq)
        if new_tq < tq:
            tq = new_tq
            continue
        if G > 1:
            G = _next_smaller_divisor(BH, G)
            continue
        break

    grid = (BH // G, nq // tq, nk // tk)

    # bf16 exp only where the EUP supports it (v6e / v7x); f32 otherwise.
    exp_dtype = (q_bh.dtype if (q_bh.dtype == jnp.bfloat16 and not is_pre_v6)
                 else jnp.float32)
    kernel = functools.partial(_flash_sdpa_kernel, exp_dtype=exp_dtype)

    kv_passes = nq // tq
    cost = pl.CostEstimate(
        flops=2 * BH * nq * nk * (dk + d_v),
        transcendentals=BH * nq * nk,
        bytes_accessed=(q_bh.size * in_elem
                        + kv_passes * (k_bh.size + v_bh.size) * in_elem
                        + BH * nq * d_v * out_elem),
    )

    # TODO(synk): for head dims < 128 (demo d_k=d_v=16) the last dim is not
    # lane-dense; a wrapper-side packing to a 128-multiple last dim would recover
    # lane/store throughput.  Left as-is for generality / correctness.
    return pl.pallas_call(
        kernel,
        out_shape=jax.ShapeDtypeStruct((BH, nq, d_v), jnp.float32),
        grid_spec=pltpu.PrefetchScalarGridSpec(
            num_scalar_prefetch=0,
            grid=grid,
            in_specs=[
                pl.BlockSpec((G, tq, dk), lambda g, qi, ki: (g, qi, 0)),
                # TODO(synk): sweep pipeline_mode=pl.Buffered(3) on K/V once tiles final.
                pl.BlockSpec((G, tk, dk), lambda g, qi, ki: (g, ki, 0)),
                pl.BlockSpec((G, tk, d_v), lambda g, qi, ki: (g, ki, 0)),
            ],
            out_specs=pl.BlockSpec((G, tq, d_v), lambda g, qi, ki: (g, qi, 0)),
            scratch_shapes=[
                pltpu.VMEM((G, tq, 1), jnp.float32),     # running max
                pltpu.VMEM((G, tq, 1), jnp.float32),     # running denom
                pltpu.VMEM((G, tq, d_v), jnp.float32),   # accumulator
            ],
        ),
        compiler_params=pltpu.CompilerParams(
            dimension_semantics=("parallel", "parallel", "arbitrary"),
            vmem_limit_bytes=budget,
        ),
        cost_estimate=cost,
    )(q_bh, k_bh, v_bh)


# --------------------------------------------------------------------------
# Module-equivalent wrapper (parameters + projection glue).
# --------------------------------------------------------------------------
class ScaledDotProductAttentionPallas:
    def __init__(self, d_model, d_k, d_v, h, key, dropout=0.0,
                 compute_dtype=jnp.bfloat16):
        self.d_model = d_model
        self.d_k = d_k
        self.d_v = d_v
        self.h = h
        # bf16 MXU operands by default (f32 stats/accum in-kernel); pass
        # compute_dtype=jnp.float32 for strict f32 parity.
        self.compute_dtype = compute_dtype
        # TODO(synk): dropout>0 not implemented (nn.Dropout(0) is identity in eval).

        # nn.Linear init per Attention.init_weights: weight ~ N(0, 0.001), bias = 0.
        k1, k2, k3, k4 = jax.random.split(key, 4)
        std = 0.001
        # PyTorch Linear stores weight as (out_features, in_features); y = x @ W^T + b.
        self.w_q = jax.random.normal(k1, (h * d_k, d_model), jnp.float32) * std
        self.b_q = jnp.zeros((h * d_k,), jnp.float32)
        self.w_k = jax.random.normal(k2, (h * d_k, d_model), jnp.float32) * std
        self.b_k = jnp.zeros((h * d_k,), jnp.float32)
        self.w_v = jax.random.normal(k3, (h * d_v, d_model), jnp.float32) * std
        self.b_v = jnp.zeros((h * d_v,), jnp.float32)
        self.w_o = jax.random.normal(k4, (d_model, h * d_v), jnp.float32) * std
        self.b_o = jnp.zeros((d_model,), jnp.float32)

    def __call__(self, queries, keys, values):
        # TODO(synk): attention_mask / attention_weights (optional args) not wired into
        # the kernel; only the None path of the PyTorch forward is implemented.
        b_s, nq, _ = queries.shape
        nk = keys.shape[1]
        h, d_k, d_v, d_model = self.h, self.d_k, self.d_v, self.d_model
        cdt = self.compute_dtype
        scale = float(d_k) ** -0.5

        # Head-major projections in f32 (no (b,n,h,d)->(b,h,n,d) HBM transpose);
        # 1/sqrt(d_k) folded into the Q projection weights/bias.
        wq = self.w_q.reshape(h, d_k, d_model) * scale
        bq = (self.b_q * scale).reshape(1, h, 1, d_k)
        wk = self.w_k.reshape(h, d_k, d_model)
        bk = self.b_k.reshape(1, h, 1, d_k)
        wv = self.w_v.reshape(h, d_v, d_model)
        bv = self.b_v.reshape(1, h, 1, d_v)

        q = (jnp.einsum("bnm,hdm->bhnd", queries, wq) + bq).astype(cdt)
        k = (jnp.einsum("bnm,hdm->bhnd", keys, wk) + bk).astype(cdt)
        v = (jnp.einsum("bnm,hdm->bhnd", values, wv) + bv).astype(cdt)

        q = q.reshape(b_s * h, nq, d_k)
        k = k.reshape(b_s * h, nk, d_k)
        v = v.reshape(b_s * h, nk, d_v)

        # Pallas flash-attention core (f32 output / stats).
        out = _sdpa_core(q, k, v)                       # (b*h, nq, d_v)
        out = out.reshape(b_s, h, nq, d_v)

        # Output projection fused with head recombination (no explicit transpose).
        wo = self.w_o.reshape(d_model, h, d_v)
        return jnp.einsum("bhqd,mhd->bqm", out, wo) + self.b_o


# --------------------------------------------------------------------------
# Pure-JAX (f32) reference, following the PyTorch forward exactly.
# --------------------------------------------------------------------------
def _reference(mod, queries, keys, values):
    b_s, nq, _ = queries.shape
    nk = keys.shape[1]
    h, d_k, d_v = mod.h, mod.d_k, mod.d_v
    q = (queries @ mod.w_q.T + mod.b_q).reshape(b_s, nq, h, d_k).transpose(0, 2, 1, 3)
    k = (keys @ mod.w_k.T + mod.b_k).reshape(b_s, nk, h, d_k).transpose(0, 2, 3, 1)
    v = (values @ mod.w_v.T + mod.b_v).reshape(b_s, nk, h, d_v).transpose(0, 2, 1, 3)
    att = jnp.matmul(q, k) / jnp.sqrt(jnp.float32(d_k))
    att = jax.nn.softmax(att, axis=-1)
    out = jnp.matmul(att, v).transpose(0, 2, 1, 3).reshape(b_s, nq, h * d_v)
    return out @ mod.w_o.T + mod.b_o


if __name__ == "__main__":
    key = jax.random.PRNGKey(0)
    k_params, k_q, k_k, k_v = jax.random.split(key, 4)

    # Small shapes consistent with the module's forward: (b_s, seq, d_model).
    b_s, nq, nk = 2, 8, 8
    d_model, d_k, d_v, h = 32, 16, 16, 4

    mod = ScaledDotProductAttentionPallas(d_model, d_k, d_v, h, k_params)

    queries = jax.random.normal(k_q, (b_s, nq, d_model), jnp.float32)
    keys = jax.random.normal(k_k, (b_s, nk, d_model), jnp.float32)
    values = jax.random.normal(k_v, (b_s, nk, d_model), jnp.float32)

    out = mod(queries, keys, values)
    out = jax.block_until_ready(out)

    ref = _reference(mod, queries, keys, values)
    assert out.shape == (b_s, nq, d_model)
    # Tolerances account for bf16 MXU operands (stats/accum are f32).
    assert jnp.allclose(out, ref, atol=5e-5, rtol=2e-2), (
        f"max abs diff {jnp.max(jnp.abs(out - ref))}")

    print("KERNEL_OK")
</pallas_src>

<mosaic_0001>
module attributes {stable_mosaic.version = 11 : i64} {
  func.func @_flash_sdpa_kernel(%arg0: i32, %arg1: i32, %arg2: i32, %arg3: memref<4x8x16xbf16, #tpu.memory_space<vmem>>, %arg4: memref<4x8x16xbf16, #tpu.memory_space<vmem>>, %arg5: memref<4x8x16xbf16, #tpu.memory_space<vmem>>, %arg6: memref<4x8x16xf32, #tpu.memory_space<vmem>>, %arg7: memref<4x8x1xf32, #tpu.memory_space<vmem>>, %arg8: memref<4x8x1xf32, #tpu.memory_space<vmem>>, %arg9: memref<4x8x16xf32, #tpu.memory_space<vmem>>) attributes {dimension_semantics = [#tpu.dimension_semantics<parallel>, #tpu.dimension_semantics<parallel>, #tpu.dimension_semantics<arbitrary>], iteration_bounds = array<i64: 2, 1, 1>, scalar_prefetch = 0 : i64, scratch_operands = 3 : i64, tpu.core_type = #tpu.core_type<tc>, window_params = [{transform_indices = @transform_0, window_bounds = array<i64: 4, 8, 16>}, {transform_indices = @transform_1, window_bounds = array<i64: 4, 8, 16>}, {transform_indices = @transform_2, window_bounds = array<i64: 4, 8, 16>}, {transform_indices = @transform_3, window_bounds = array<i64: 4, 8, 16>}]} {
    %c0_i32 = arith.constant 0 : i32
    %0 = arith.cmpi eq, %arg2, %c0_i32 : i32
    %1 = arith.extui %0 : i1 to i32
    %c0_i32_0 = arith.constant 0 : i32
    %2 = arith.cmpi ne, %1, %c0_i32_0 : i32
    scf.if %2 {
      %cst_32 = arith.constant 0xFF800000 : f32
      %34 = vector.broadcast %cst_32 : f32 to vector<4x8x1xf32>
      %c0_33 = arith.constant 0 : index
      %c0_34 = arith.constant 0 : index
      %c0_35 = arith.constant 0 : index
      %35 = vector.load %arg7[%c0_33, %c0_34, %c0_35] : memref<4x8x1xf32, #tpu.memory_space<vmem>>, vector<4x8x1xf32>
      tpu.vector_store %arg7[%c0_33, %c0_34, %c0_35], %34 {strides = array<i32>} : memref<4x8x1xf32, #tpu.memory_space<vmem>>, vector<4x8x1xf32>,
      %cst_36 = arith.constant 0.000000e+00 : f32
      %36 = vector.broadcast %cst_36 : f32 to vector<4x8x1xf32>
      %c0_37 = arith.constant 0 : index
      %c0_38 = arith.constant 0 : index
      %c0_39 = arith.constant 0 : index
      %37 = vector.load %arg8[%c0_37, %c0_38, %c0_39] : memref<4x8x1xf32, #tpu.memory_space<vmem>>, vector<4x8x1xf32>
      tpu.vector_store %arg8[%c0_37, %c0_38, %c0_39], %36 {strides = array<i32>} : memref<4x8x1xf32, #tpu.memory_space<vmem>>, vector<4x8x1xf32>,
      %cst_40 = arith.constant 0.000000e+00 : f32
      %38 = vector.broadcast %cst_40 : f32 to vector<4x8x16xf32>
      %c0_41 = arith.constant 0 : index
      %c0_42 = arith.constant 0 : index
      %c0_43 = arith.constant 0 : index
      %39 = vector.load %arg9[%c0_41, %c0_42, %c0_43] : memref<4x8x16xf32, #tpu.memory_space<vmem>>, vector<4x8x16xf32>
      tpu.vector_store %arg9[%c0_41, %c0_42, %c0_43], %38 {strides = array<i32>} : memref<4x8x16xf32, #tpu.memory_space<vmem>>, vector<4x8x16xf32>,
    } else {
    }
    %c0 = arith.constant 0 : index
    %c0_1 = arith.constant 0 : index
    %c0_2 = arith.constant 0 : index
    %3 = vector.load %arg3[%c0, %c0_1, %c0_2] : memref<4x8x16xbf16, #tpu.memory_space<vmem>>, vector<4x8x16xbf16>
    %c0_3 = arith.constant 0 : index
    %c0_4 = arith.constant 0 : index
    %c0_5 = arith.constant 0 : index
    %4 = vector.load %arg4[%c0_3, %c0_4, %c0_5] : memref<4x8x16xbf16, #tpu.memory_space<vmem>>, vector<4x8x16xbf16>
    "tpu.trace_start"() <{level = 10 : i32, message = "gqd,gkd->gqk"}> : () -> ()
    %cst = arith.constant dense<0.000000e+00> : vector<4x8x8xf32>
    %5 = tpu.matmul %3, %4, %cst {dimension_numbers = #tpu.dot_dimension_numbers<[2], [2], [1], [1], [0, 0, 0, 1, 1, 1], [0], [0]>} : vector<4x8x16xbf16>, vector<4x8x16xbf16>, vector<4x8x8xf32> -> vector<4x8x8xf32>
    "tpu.trace_stop"() : () -> ()
    %c0_6 = arith.constant 0 : index
    %c0_7 = arith.constant 0 : index
    %c0_8 = arith.constant 0 : index
    %6 = vector.load %arg7[%c0_6, %c0_7, %c0_8] : memref<4x8x1xf32, #tpu.memory_space<vmem>>, vector<4x8x1xf32>
    %cst_9 = arith.constant dense<0xFF800000> : vector<4x8xf32>
    %7 = vector.multi_reduction <maximumf>, %5, %cst_9 [2] : vector<4x8x8xf32> to vector<4x8xf32>
    %8 = vector.shape_cast %7 : vector<4x8xf32> to vector<4x8x1xf32>
    %9 = arith.maximumf %6, %8 : vector<4x8x1xf32>
    %10 = arith.subf %6, %9 : vector<4x8x1xf32>
    %11 = math.exp %10 : vector<4x8x1xf32>
    %12 = vector.broadcast %9 : vector<4x8x1xf32> to vector<4x8x8xf32>
    %13 = arith.subf %5, %12 : vector<4x8x8xf32>
    %14 = arith.truncf %13 : vector<4x8x8xf32> to vector<4x8x8xbf16>
    %15 = math.exp %14 : vector<4x8x8xbf16>
    %c0_10 = arith.constant 0 : index
    %c0_11 = arith.constant 0 : index
    %c0_12 = arith.constant 0 : index
    %16 = vector.load %arg8[%c0_10, %c0_11, %c0_12] : memref<4x8x1xf32, #tpu.memory_space<vmem>>, vector<4x8x1xf32>
    %17 = arith.mulf %11, %16 : vector<4x8x1xf32>
    %18 = arith.extf %15 : vector<4x8x8xbf16> to vector<4x8x8xf32>
    %cst_13 = arith.constant dense<0.000000e+00> : vector<4x8xf32>
    %19 = vector.multi_reduction <add>, %18, %cst_13 [2] : vector<4x8x8xf32> to vector<4x8xf32>
    %20 = vector.shape_cast %19 : vector<4x8xf32> to vector<4x8x1xf32>
    %21 = arith.addf %17, %20 : vector<4x8x1xf32>
    %c0_14 = arith.constant 0 : index
    %c0_15 = arith.constant 0 : index
    %c0_16 = arith.constant 0 : index
    %22 = vector.load %arg8[%c0_14, %c0_15, %c0_16] : memref<4x8x1xf32, #tpu.memory_space<vmem>>, vector<4x8x1xf32>
    tpu.vector_store %arg8[%c0_14, %c0_15, %c0_16], %21 {strides = array<i32>} : memref<4x8x1xf32, #tpu.memory_space<vmem>>, vector<4x8x1xf32>,
    %c0_17 = arith.constant 0 : index
    %c0_18 = arith.constant 0 : index
    %c0_19 = arith.constant 0 : index
    %23 = vector.load %arg9[%c0_17, %c0_18, %c0_19] : memref<4x8x16xf32, #tpu.memory_space<vmem>>, vector<4x8x16xf32>
    %24 = vector.broadcast %11 : vector<4x8x1xf32> to vector<4x8x16xf32>
    %25 = arith.mulf %24, %23 : vector<4x8x16xf32>
    %c0_20 = arith.constant 0 : index
    %c0_21 = arith.constant 0 : index
    %c0_22 = arith.constant 0 : index
    %26 = vector.load %arg5[%c0_20, %c0_21, %c0_22] : memref<4x8x16xbf16, #tpu.memory_space<vmem>>, vector<4x8x16xbf16>
    "tpu.trace_start"() <{level = 10 : i32, message = "gqk,gkd->gqd"}> : () -> ()
    %cst_23 = arith.constant dense<0.000000e+00> : vector<4x8x16xf32>
    %27 = tpu.matmul %15, %26, %cst_23 {dimension_numbers = #tpu.dot_dimension_numbers<[2], [1], [1], [2], [0, 0, 0, 1, 1, 2], [0], [0]>} : vector<4x8x8xbf16>, vector<4x8x16xbf16>, vector<4x8x16xf32> -> vector<4x8x16xf32>
    "tpu.trace_stop"() : () -> ()
    %28 = arith.addf %25, %27 : vector<4x8x16xf32>
    %c0_24 = arith.constant 0 : index
    %c0_25 = arith.constant 0 : index
    %c0_26 = arith.constant 0 : index
    %29 = vector.load %arg9[%c0_24, %c0_25, %c0_26] : memref<4x8x16xf32, #tpu.memory_space<vmem>>, vector<4x8x16xf32>
    tpu.vector_store %arg9[%c0_24, %c0_25, %c0_26], %28 {strides = array<i32>} : memref<4x8x16xf32, #tpu.memory_space<vmem>>, vector<4x8x16xf32>,
    %c0_27 = arith.constant 0 : index
    %c0_28 = arith.constant 0 : index
    %c0_29 = arith.constant 0 : index
    %30 = vector.load %arg7[%c0_27, %c0_28, %c0_29] : memref<4x8x1xf32, #tpu.memory_space<vmem>>, vector<4x8x1xf32>
    tpu.vector_store %arg7[%c0_27, %c0_28, %c0_29], %9 {strides = array<i32>} : memref<4x8x1xf32, #tpu.memory_space<vmem>>, vector<4x8x1xf32>,
    %c0_i32_30 = arith.constant 0 : i32
    %31 = arith.cmpi eq, %arg2, %c0_i32_30 : i32
    %32 = arith.extui %31 : i1 to i32
    %c0_i32_31 = arith.constant 0 : i32
    %33 = arith.cmpi ne, %32, %c0_i32_31 : i32
    scf.if %33 {
      %c0_32 = arith.constant 0 : index
      %c0_33 = arith.constant 0 : index
      %c0_34 = arith.constant 0 : index
      %34 = vector.load %arg8[%c0_32, %c0_33, %c0_34] : memref<4x8x1xf32, #tpu.memory_space<vmem>>, vector<4x8x1xf32>
      %35 = tpu.reciprocal %34 {approx = true} : vector<4x8x1xf32> -> vector<4x8x1xf32>
      %c0_35 = arith.constant 0 : index
      %c0_36 = arith.constant 0 : index
      %c0_37 = arith.constant 0 : index
      %36 = vector.load %arg9[%c0_35, %c0_36, %c0_37] : memref<4x8x16xf32, #tpu.memory_space<vmem>>, vector<4x8x16xf32>
      %37 = vector.broadcast %35 : vector<4x8x1xf32> to vector<4x8x16xf32>
      %38 = arith.mulf %36, %37 : vector<4x8x16xf32>
      %c0_38 = arith.constant 0 : index
      %c0_39 = arith.constant 0 : index
      %c0_40 = arith.constant 0 : index
      %39 = vector.load %arg6[%c0_38, %c0_39, %c0_40] : memref<4x8x16xf32, #tpu.memory_space<vmem>>, vector<4x8x16xf32>
      tpu.vector_store %arg6[%c0_38, %c0_39, %c0_40], %38 {strides = array<i32>} : memref<4x8x16xf32, #tpu.memory_space<vmem>>, vector<4x8x16xf32>,
    } else {
    }
    return
  }
  func.func @transform_0(%arg0: i32, %arg1: i32, %arg2: i32) -> (i32, i32, i32) {
    %c0_i32 = arith.constant 0 : i32
    %c0_i32_0 = arith.constant 0 : i32
    return %arg0, %arg1, %c0_i32 : i32, i32, i32
  }
  func.func @transform_1(%arg0: i32, %arg1: i32, %arg2: i32) -> (i32, i32, i32) {
    %c0_i32 = arith.constant 0 : i32
    %c0_i32_0 = arith.constant 0 : i32
    return %arg0, %arg2, %c0_i32 : i32, i32, i32
  }
  func.func @transform_2(%arg0: i32, %arg1: i32, %arg2: i32) -> (i32, i32, i32) {
    %c0_i32 = arith.constant 0 : i32
    %c0_i32_0 = arith.constant 0 : i32
    return %arg0, %arg2, %c0_i32 : i32, i32, i32
  }
  func.func @transform_3(%arg0: i32, %arg1: i32, %arg2: i32) -> (i32, i32, i32) {
    %c0_i32 = arith.constant 0 : i32
    %c0_i32_0 = arith.constant 0 : i32
    return %arg0, %arg1, %c0_i32 : i32, i32, i32
  }
}

</mosaic_0001>

<bundles_post_ra>
// kernel: tpu_custom_call.1
= control target key start
LH: loop header
LB: loop body
LE: loop exit
PB: predicated region body
PF: predicated region fallthrough
CT: control target
= control target key end

     0   :  { %s1457_s0 = inlined_call_operand.hbm [shape: bf16[8,8,16], index: 0, kind: input, shape index: {}]   ;;  %s1458_s1 = inlined_call_operand.hbm [shape: bf16[8,8,16], index: 1, kind: input, shape index: {}]   ;;  %s1459_s2 = inlined_call_operand.hbm [shape: bf16[8,8,16], index: 2, kind: input, shape index: {}]   ;;  %s1460_s3 = inlined_call_operand.hbm [shape: f32[8,8,16], index: 3, kind: output, shape index: {}]  }
   0x1   :  { %1466 = sst [smem:[#allocation20_spill]] %s1458_s1 }
   0x2   :  { %8 = vsyncpa [#allocation6], 0 }
   0x3   :  { %10 = vsyncpa [#allocation6 + $0x1], 0 }
   0x4   :  { %11 = vsyncpa [#allocation9], 0 }
   0x5   :  { %13 = vsyncpa [#allocation9 + $0x1], 0 }
   0x6   :  { %14 = vsyncpa [#allocation7], 0 }
   0x7   :  { %16 = vsyncpa [#allocation7 + $0x1], 0  ;;  %s1182_s12 = smov 0   ;;  %s1184_s13 = smov 0  }
   0x8   :  { %s1186_s14 = smov 0   ;;  %s1188_s15 = smov 0  }
   0x9   :  { %s1190_s16 = smov 0   ;;  %s1192_s17 = smov 0  }
   0xa LB: > { %1467 = sst [smem:[#allocation15_spill]] %s1141_s14  ;;  %s1213_s18 = sadd.s32 4294967295, %s1153_s17   ;;  %s1153_s17 = sphi %s1192_s17, %s22_s17   ;;  %s1149_s16 = sphi %s1190_s16, %s1483_s16   ;;  %s1145_s15 = sphi %s1188_s15, %s1482_s15   ;;  %s1141_s14 = sphi %s1186_s14, %s1481_s14   ;;  %s1137_s13 = sphi %s1184_s13, %s1485_s13   ;;  %s1133_s12 = sphi %s1182_s12, %s1484_s12  }
   0xb   : > { %1468 = sst [smem:[#allocation16_spill]] %s1149_s16  ;;  %s837_s19 = sadd.s32 4294967294, %s1153_s17  }
   0xc   : > { %1469 = sst [smem:[#allocation17_spill]] %s1153_s17  ;;  %s41_s20 = sadd.s32 1, %s1149_s16 }
   0xd   : > { %s50_s21 = sadd.s32 1, %s1141_s14  ;;  %p43_p0 = scmp.ge.s32.totalorder %s41_s20, 2 }
   0xe   : > { %p57_p1 = scmp.ne.s32.totalorder %s1141_s14, %s1137_s13  ;;  %p58_p2 = scmp.eq.s32.totalorder %s1153_s17, 0 }
   0xf   : > { %p63_p3 = scmp.ne.s32.totalorder %s1137_s13, %s1133_s12  ;;  %s1487_s20 = smov (%p43_p0, %s41_s20), 0 }
  0x10   : > { %1470 = sst [smem:[#allocation18_spill]] %s1487_s20  ;;  %p1225_p4 = por %p58_p2, %p57_p1 }
  0x11   : > { %p64_p5 = scmp.eq.s32.totalorder %s1213_s18, 0  ;;  %s45_s23 = ssub.s32 %s1149_s16, %s1487_s20 }
  0x12   : > { %p145_p6 = scmp.eq.s32.totalorder %s1213_s18, 1  ;;  %p48_p7 = scmp.eq.s32.totalorder %s45_s23, 0 }
  0x13   : > { %p1233_p8 = por %p64_p5, %p63_p3  ;;  %p151_p10 = scmp.eq.s32.totalorder %s837_s19, 1 }
  0x14   : > { %p1237_p9 = por %p145_p6, %p57_p1  ;;  %p839_p12 = scmp.ge.s32.totalorder %s1153_s17, 2 }
  0x15   : > { %s1242_s26 = scalar_select %p48_p7, %s1141_s14, %s50_s21  }
  0x16   : > { %p1244_p11 = por %p151_p10, %p63_p3  ;;  %p893_p13 = scmp.lt.s32.totalorder %s1153_s17, 2 }
  0x17   : > { %1474 = sst [smem:[#allocation19_spill]] %s1242_s26  ;;  %s171_s28 = sand.u32 1, %s1141_s14  }
  0x18   : > { %s1251_s29 = sshll.u32 %s171_s28, 4  ;;  %s867_s30 = sshll.u32 %s1149_s16, 4 }
  0x19   : > { %p1256_p0 = pnand %p893_p13, %p1225_p4  ;;  %s194_s5 = sand.u32 1, %s1153_s17  }
  0x1a   : > { %s1477_s1 = sld [smem:[#allocation20_spill]]  ;;  %s198_s10 = scalar_lea.vmem [#allocation8], %s1251_s29 }
  0x1b   : > { %s207_s11 = sshll.u32 %s198_s10, 4  ;;  %s195_s19 = scalar_lea.sflag [#allocation9], %s194_s5  ;;  %s208_s11 = int_to_ptr.vmem [resolvable:$true] %s207_s11 }
  0x1c   : > { %s1155_s21 = smov 64   ;;  %s1156_s22 = smov 4  }
  0x1d   : > { %p849_p1 = scmp.ge.s32.totalorder %s1153_s17, 1  ;;  %p238_p2 = scmp.lt.s32.totalorder %s1153_s17, 3 }
  0x1e   : > { %s172_s5 = scalar_lea.sflag [#allocation6], %s171_s28  ;;  %s227_s16 = scalar_lea.hbm %s1459_s2, %s867_s30 }
  0x1f   : > { %p1269_p3 = pnand %p849_p1, %p238_p2  ;;  %s228_s26 = sshll.u32 %s227_s16, 4  ;;  %s229_s26 = int_to_ptr.hbm [resolvable:$true] %s228_s26 }
  0x20   : > { %s204_s8 = scalar_lea.hbm %s1477_s1, %s867_s30  ;;  %s175_s1 = scalar_lea.vmem [#allocation5], %s1251_s29 }
  0x21   : > { %s205_s9 = sshll.u32 %s204_s8, 4  ;;  %s181_s8 = scalar_lea.hbm %s1457_s0, %s867_s30  ;;  %s206_s9 = int_to_ptr.hbm [resolvable:$true] %s205_s9 }
  0x22   : > { %885 = dma.hbm_to_vmem [thread:$0]  (!%p1256_p0), %s206_s9, 256, %s208_s11, %s195_s19, %s1155_s21, %s1155_s21, %s1156_s22  }
  0x23   : > { %s182_s10 = sshll.u32 %s181_s8, 4  ;;  %s184_s20 = sshll.u32 %s175_s1, 4  ;;  %s183_s10 = int_to_ptr.hbm [resolvable:$true] %s182_s10  ;;  %s185_s20 = int_to_ptr.vmem [resolvable:$true] %s184_s20 }
  0x24   : > { %882 = dma.hbm_to_vmem [thread:$0]  (!%p1256_p0), %s183_s10, 256, %s185_s20, %s172_s5, %s1155_s21, %s1155_s21, %s1156_s22  }
  0x25   : > { %s221_s14 = scalar_lea.vmem [#allocation10], %s1251_s29  ;;  %242 = sbr.rel (%p1269_p3) target bundleno = 738 (0x2e2), region = 32 }
  0x26   : > { %s230_s17 = sshll.u32 %s221_s14, 4  ;;  %s1288_s1 = sand.u32 (!%p1269_p3), 1, %s1137_s13   ;;  %s231_s17 = int_to_ptr.vmem [resolvable:$true] %s230_s17 }
  0x27   : > { %888 = dma.hbm_to_vmem [thread:$0]  (!%p1256_p0), %s229_s26, 256, %s231_s17, %s195_s19, %s1155_s21, %s1155_s21, %s1156_s22  }
  0x28   : > { %s1291_s20 = sshll.u32 (!%p1269_p3), %s1288_s1, 4  ;;  %s245_s28 = scalar_lea.sflag (!%p1269_p3), [#allocation6], %s1288_s1 }
  0x29   : > { %s248_s16 = scalar_lea.vmem (!%p1269_p3), [#allocation5], %s1291_s20 }
  0x2a   : > { %1120 = dma.done.wait (%p1233_p8), %s245_s28, 256  }
  0x2b   : > { %1122 = vsyncadd (%p1233_p8), %s245_s28, 4294967040  ;;  %s254_s14 = sand.u32 1, %s1213_s18   ;;  %s258_s26 = scalar_lea.vmem [#allocation8], %s1291_s20 }
  0x2c   : > { %s255_s17 = scalar_lea.sflag [#allocation9], %s254_s14 }
  0x2d   : > { %1124 = dma.done.wait (%p1233_p8), %s255_s17, 512  }
  0x2e   : > { %1126 = vsyncadd (%p1233_p8), %s255_s17, 4294966784  ;;  %vm320_vm0 = vcmask 130048   ;;  %v329_v0 = vld [vmem:[%s258_s26] sm:$0xf]  ;;  %v331_v1 = vld [vmem:[%s258_s26 + $0x8] sm:$0xf] }
  0x2f   : > { %v338_v2 = vsel %vm320_vm0, %v329_v0, 0  ;;  %v376_v3 = vsel %vm320_vm0, %v331_v1, 0  ;;  %v330_v4 = vld [vmem:[%s258_s26 + $0x4] sm:$0xf]  ;;  %v332_v6 = vld [vmem:[%s258_s26 + $0xc] sm:$0xf] }
  0x30   : > { %347 = vmatpush.bf16.xpose.msra.mxu0 %v338_v2  ;;  %385 = vmatpush.bf16.xpose.msra.mxu2 %v376_v3  ;;  %v357_v5 = vsel %vm320_vm0, %v330_v4, 0  ;;  %v395_v7 = vsel %vm320_vm0, %v332_v6, 0  ;;  %v325_v8 = vld [vmem:[%s248_s16] sm:$0xf]  ;;  %v327_v9 = vld [vmem:[%s248_s16 + $0x8] sm:$0xf] }
  0x31   : > { %366 = vmatpush.bf16.xpose.msra.mxu1 %v357_v5  ;;  %404 = vmatpush.bf16.xpose.msra.mxu3 %v395_v7  ;;  %v326_v10 = vld [vmem:[%s248_s16 + $0x4] sm:$0xf]  ;;  %v328_v11 = vld [vmem:[%s248_s16 + $0xc] sm:$0xf]  ;;  %vm311_vm1 = vcmask 7168   ;;  %v1157_v12 = vmov -inf  }
  0x32   : > { %312 = vst.msk [vmem:[#allocation2] sm:$0xff] %vm311_vm1, %v1157_v12  ;;  %vm414_vm2 = vcmask 64512   ;;  %v1158_v25 = vmov 0   ;;  %v1159_v26 = vmov 0.0   ;;  %s268_s18 = scalar_lea.vmem [#allocation10], %s1291_s20  ;;  %vm555_vm3 = vcmask 1043456  }
  0x33   : > { %313 = vst.msk [vmem:[#allocation2 + $0x8] sm:$0xff] %vm311_vm1, %v1157_v12  ;;  %951 = vset.pattern.permute.xlu0 %v1158_v25  ;;  %950 = vset.pattern.permute.xlu2 %v1158_v25  ;;  %v550_v43 = vld [vmem:[%s268_s18 + $0x8] sm:$0xf]  ;;  %v551_v45 = vld [vmem:[%s268_s18 + $0xc] sm:$0xf]  ;;  %s853_s24 = sshll.u32 %s1288_s1, 5 }
  0x34   : > { %314 = vst.msk [vmem:[#allocation2 + $0x10] sm:$0xff] %vm311_vm1, %v1157_v12  ;;  %952 = vset.pattern.permute.xlu1 %v1158_v25  ;;  %v595_v44 = vsel %vm555_vm3, %v550_v43, 0  ;;  %v614_v46 = vsel %vm555_vm3, %v551_v45, 0  ;;  %v548_v47 = vld [vmem:[%s268_s18] sm:$0xf]  ;;  %s301_s29 = scalar_lea.vmem [#allocation11], %s853_s24 }
  0x35   : > { %315 = vst.msk [vmem:[#allocation2 + $0x18] sm:$0xff] %vm311_vm1, %v1157_v12  ;;  %v557_v49 = vsel %vm555_vm3, %v548_v47, 0  ;;  %v549_v54 = vld [vmem:[%s268_s18 + $0x4] sm:$0xf]  ;;  %s870_s30 = sshll.u32 %s1145_s15, 5  ;;  %s698_s22 = sshll.u32 %s301_s29, 4  ;;  %s699_s22 = int_to_ptr.vmem [resolvable:$true] %s698_s22 }
  0x36   : > { %318 = vst.msk [vmem:[#allocation3 + $0x10] sm:$0xff] %vm311_vm1, %v1159_v26  ;;  %v576_v56 = vsel %vm555_vm3, %v549_v54, 0  ;;  %s697_s21 = scalar_lea.hbm %s1460_s3, %s870_s30  ;;  %s685_s6 = scalar_lea.sflag [#allocation7], %s1288_s1 }
  0x37   : > { %854 = vmatmul.msk.bf16.vlgmr.msra.gmra.mxu0 %vm320_vm0, %v325_v8  ;;  %856 = vmatmul.msk.bf16.vlgmr.msra.gmra.mxu2 %vm320_vm0, %v327_v9  ;;  %316 = vst.msk [vmem:[#allocation3] sm:$0xff] %vm311_vm1, %v1159_v26  ;;  %s700_s23 = sshll.u32 %s697_s21, 4  ;;  %s1087_s5 = scalar_lea.hbm %s1460_s3, 64  ;;  %s701_s23 = int_to_ptr.hbm [resolvable:$true] %s700_s23 }
  0x38   : > { %855 = vmatmul.msk.bf16.vlgmr.msra.gmra.mxu1 %vm320_vm0, %v326_v10  ;;  %857 = vmatmul.msk.bf16.vlgmr.msra.gmra.mxu3 %vm320_vm0, %v328_v11  ;;  %317 = vst.msk [vmem:[#allocation3 + $0x8] sm:$0xff] %vm311_vm1, %v1159_v26  ;;  %s1081_s7 = sshra.s32 %s701_s23, 4  ;;  %s1082_s7 = int_to_ptr.hbm [resolvable:$true] %s1081_s7 }
  0x39   : > { %319 = vst.msk [vmem:[#allocation3 + $0x18] sm:$0xff] %vm311_vm1, %v1159_v26  ;;  %v1338_v27 = vld [vmem:[#allocation2] sm:$0xff]  ;;  %604 = vmatpush.bf16.msrb.mxu2 %v595_v44  ;;  %623 = vmatpush.bf16.msrb.mxu3 %v614_v46  ;;  %s1083_s8 = scalar_lea.hbm %s1082_s7, 32  ;;  %p1088_p7 = scmp.lt.s32.totalorder %s1082_s7, %s1460_s3 }
  0x3a   : > { %321 = vst.msk [vmem:[#allocation4] sm:$0xff] %vm320_vm0, %v1159_v26  ;;  %v1350_v33 = vld [vmem:[#allocation2 + $0x8] sm:$0xff]  ;;  %566 = vmatpush.bf16.msrb.mxu0 %v557_v49  ;;  %585 = vmatpush.bf16.msrb.mxu1 %v576_v56  ;;  %p1084_p4 = scmp.ne.s32.totalorder %s1082_s7, %s1083_s8  ;;  %p1089_p8 = scmp.lt.s32.totalorder %s1087_s5, %s1083_s8 }
  0x3b   : > { %322 = vst.msk [vmem:[#allocation4 + $0x8] sm:$0xff] %vm320_vm0, %v1159_v26  ;;  %v1348_v31 = vld [vmem:[#allocation2 + $0x10] sm:$0xff] }
  0x3c   : > { %323 = vst.msk [vmem:[#allocation4 + $0x10] sm:$0xff] %vm320_vm0, %v1159_v26  ;;  %v1368_v39 = vld [vmem:[#allocation2 + $0x18] sm:$0xff]  ;;  %p1085_p5 = pnand %p1084_p4, %p1237_p9  ;;  %p1090_p10 = por %p1089_p8, %p1088_p7 }
  0x3d   : > { %324 = vst.msk [vmem:[#allocation4 + $0x18] sm:$0xff] %vm320_vm0, %v1159_v26 }
  0x3e   : > { %p1086_p6 = pneg %p1085_p5 }
  0x40   : > { %p1091_p13 = pnand %p1090_p10, %p1086_p6 }
  0x41   : > { %v520_v45 = vld [vmem:[#allocation4] sm:$0xff] }
  0xb4   : > { %v1317_v13 = vpop.f32.mrf.mxu0 }
  0xb5   : > { %v415_v14 = vsel %vm414_vm2, %v1317_v13, -inf  ;;  %v1321_v15 = vpop.f32.mrf.mxu1 }
  0xb6   : > { %416 = vmax.xlane.f32.xlu1 %v415_v14  ;;  %v418_v18 = vsel %vm414_vm2, %v1321_v15, -inf }
  0xba   : > { %v387_v16 = vpop.f32.mrf.mxu2 }
  0xbb   : > { %v421_v17 = vsel %vm414_vm2, %v387_v16, -inf  ;;  %v1326_v20 = vpop.f32.mrf.mxu3 }
  0xbc   : > { %422 = vmax.xlane.f32.xlu0 %v421_v17  ;;  %v351_v19 = vpop.f32.mrf.mxu0  ;;  %v424_v22 = vsel %vm414_vm2, %v1326_v20, -inf }
  0xbd   : > { %v370_v21 = vpop.f32.mrf.mxu1 }
  0xbe   : > { %419 = vmax.xlane.f32.xlu1 %v418_v18 }
  0xc2   : > { %v389_v23 = vpop.f32.mrf.mxu2 }
  0xc3   : > { %v408_v24 = vpop.f32.mrf.mxu3 }
  0xc4   : > { %425 = vmax.xlane.f32.xlu0 %v424_v22 }
 0x129   : > { %v417_v28 = vpop.xlane.xlu1 %416 }
 0x12a   : > { %v1341_v29 = vmax.f32 %v1338_v27, %v417_v28 }
 0x12c   : > { %v431_v30 = vsub.f32 %v1338_v27, %v1341_v29  ;;  %637 = vst.msk [vmem:[#allocation2] sm:$0xff] %vm311_vm1, %v1341_v29  ;;  %445 = vperm.xlu0 %951, %v1341_v29  }
 0x12f   : > { %v423_v32 = vpop.xlane.xlu0 %422 }
 0x130   : > { %v1353_v34 = vmax.f32 %v1348_v31, %v423_v32 }
 0x131   : > { %v420_v35 = vpop.xlane.xlu1 %419 }
 0x132   : > { %v433_v36 = vsub.f32 %v1348_v31, %v1353_v34  ;;  %639 = vst.msk [vmem:[#allocation2 + $0x10] sm:$0xff] %vm311_vm1, %v1353_v34  ;;  %v1360_v37 = vmax.f32 %v1350_v33, %v420_v35  ;;  %455 = vperm.xlu2 %950, %v1353_v34  }
 0x134   : > { %v432_v38 = vsub.f32 %v1350_v33, %v1360_v37  ;;  %638 = vst.msk [vmem:[#allocation2 + $0x8] sm:$0xff] %vm311_vm1, %v1360_v37  ;;  %450 = vperm.xlu1 %952, %v1360_v37   ;;  %v439_v22 = vmul.f32 1.442695, %v433_v36  ;;  %v487_v37 = vld [vmem:[#allocation3] sm:$0xff] }
 0x136   : > { %v437_v23 = vmul.f32 1.442695, %v432_v38 }
 0x137   : > { %v426_v40 = vpop.xlane.xlu0 %425 }
 0x138   : > { %v1371_v41 = vmax.f32 %v1368_v39, %v426_v40 }
 0x13a   : > { %v434_v42 = vsub.f32 %v1368_v39, %v1371_v41  ;;  %640 = vst.msk [vmem:[#allocation2 + $0x18] sm:$0xff] %vm311_vm1, %v1371_v41  ;;  %460 = vperm.xlu2 %950, %v1371_v41  }
 0x13c   : > { %v441_v29 = vmul.f32 1.442695, %v434_v42  ;;  %v488_v42 = vld [vmem:[#allocation3 + $0x8] sm:$0xff] }
 0x18c   : > { %v456_v48 = vpop.permute.xlu2 %455 }
 0x18d   : > { %v465_v50 = vsub.f32 %v387_v16, %v456_v48 }
 0x18f   : > { %v469_v51 = vpack.c.bf16 %v465_v50, %v465_v50 }
 0x191   : > { %v473_v52 = vunpack.c.l.bf16 %v469_v51 }
 0x193   : > { %v479_v53 = vmul.f32 1.442695, %v473_v52 }
 0x194   : > { %v461_v55 = vpop.permute.xlu2 %460 }
 0x195   : > { %953 = vpow2.f32 %v479_v53  ;;  %v466_v57 = vsub.f32 %v1326_v20, %v461_v55  ;;  %v522_v55 = vld [vmem:[#allocation4 + $0x10] sm:$0xff] }
 0x197   : > { %v470_v58 = vpack.c.bf16 %v466_v57, %v466_v57 }
 0x199   : > { %v474_v59 = vunpack.c.l.bf16 %v470_v58 }
 0x19b   : > { %v954_v60 = vpop.eup %953  ;;  %v481_v61 = vmul.f32 1.442695, %v474_v59 }
 0x19c   : > { %v485_v62 = vpack.c.bf16 %v954_v60, %v954_v60 }
 0x19d   : > { %955 = vpow2.f32 %v481_v61 }
 0x19e   : > { %860 = vmatmul.msk.bf16.vlgmr.msrb.gmra.mxu2 %vm414_vm2, %v485_v62  ;;  %v446_v63 = vpop.permute.xlu0 %445  ;;  %v497_v0 = vunpack.c.l.bf16 %v485_v62 }
 0x19f   : > { %v463_v1 = vsub.f32 %v1317_v13, %v446_v63 }
 0x1a0   : > { %v505_v2 = vsel %vm414_vm2, %v497_v0, 0.0 }
 0x1a1   : > { %v467_v3 = vpack.c.bf16 %v463_v1, %v463_v1  ;;  %506 = vadd.xlane.f32.xlu0 %v505_v2  ;;  %v521_v1 = vld [vmem:[#allocation4 + $0x8] sm:$0xff] }
 0x1a3   : > { %v956_v4 = vpop.eup %955  ;;  %v471_v5 = vunpack.c.l.bf16 %v467_v3 }
 0x1a4   : > { %v486_v6 = vpack.c.bf16 %v956_v4, %v956_v4 }
 0x1a5   : > { %v475_v7 = vmul.f32 1.442695, %v471_v5  ;;  %v490_v5 = vld [vmem:[#allocation3 + $0x18] sm:$0xff] }
 0x1a6   : > { %861 = vmatmul.msk.bf16.vlgmr.msrb.gmra.mxu3 %vm414_vm2, %v486_v6  ;;  %v451_v8 = vpop.permute.xlu1 %450  ;;  %v498_v28 = vunpack.c.l.bf16 %v486_v6 }
 0x1a7   : > { %957 = vpow2.f32 %v475_v7  ;;  %v464_v9 = vsub.f32 %v1321_v15, %v451_v8  ;;  %v435_v15 = vmul.f32 1.442695, %v431_v30  ;;  %v489_v30 = vld [vmem:[#allocation3 + $0x10] sm:$0xff] }
 0x1a8   : > { %v508_v27 = vsel %vm414_vm2, %v498_v28, 0.0 }
 0x1a9   : > { %v468_v10 = vpack.c.bf16 %v464_v9, %v464_v9  ;;  %v523_v9 = vld [vmem:[#allocation4 + $0x18] sm:$0xff] }
 0x1ab   : > { %v472_v11 = vunpack.c.l.bf16 %v468_v10 }
 0x1ad   : > { %v958_v12 = vpop.eup %957  ;;  %v477_v14 = vmul.f32 1.442695, %v472_v11 }
 0x1ae   : > { %v483_v16 = vpack.c.bf16 %v958_v12, %v958_v12 }
 0x1af   : > { %959 = vpow2.f32 %v477_v14 }
 0x1b0   : > { %858 = vmatmul.msk.bf16.vlgmr.msrb.gmra.mxu0 %vm414_vm2, %v483_v16  ;;  %v495_v13 = vunpack.c.l.bf16 %v483_v16  ;;  %961 = vpow2.f32 %v435_v15 }
 0x1b1   : > { %963 = vpow2.f32 %v439_v22 }
 0x1b2   : > { %v499_v17 = vsel %vm414_vm2, %v495_v13, 0.0  ;;  %965 = vpow2.f32 %v437_v23 }
 0x1b3   : > { %500 = vadd.xlane.f32.xlu2 %v499_v17  ;;  %967 = vpow2.f32 %v441_v29 }
 0x1b5   : > { %v960_v18 = vpop.eup %959 }
 0x1b6   : > { %v484_v19 = vpack.c.bf16 %v960_v18, %v960_v18  ;;  %v962_v24 = vpop.eup %961 }
 0x1b7   : > { %v964_v25 = vpop.eup %963  ;;  %v491_v40 = vmul.f32 %v962_v24, %v487_v37 }
 0x1b8   : > { %859 = vmatmul.msk.bf16.vlgmr.msrb.gmra.mxu1 %vm414_vm2, %v484_v19  ;;  %v496_v20 = vunpack.c.l.bf16 %v484_v19  ;;  %v966_v26 = vpop.eup %965  ;;  %v493_v32 = vmul.f32 %v964_v25, %v489_v30 }
 0x1b9   : > { %v968_v31 = vpop.eup %967  ;;  %v492_v47 = vmul.f32 %v966_v26, %v488_v42 }
 0x1ba   : > { %v502_v21 = vsel %vm414_vm2, %v496_v20, 0.0  ;;  %v494_v6 = vmul.f32 %v968_v31, %v490_v5 }
 0x1bb   : > { %503 = vadd.xlane.f32.xlu1 %v502_v21 }
 0x1cb   : > { %526 = vperm.xlu2 %950, %v962_v24  }
 0x1d3   : > { %536 = vperm.xlu2 %950, %v964_v25  }
 0x1d4   : > { %531 = vperm.xlu1 %952, %v966_v26  }
 0x1fc   : > { %509 = vadd.xlane.f32.xlu2 %v508_v27 }
 0x214   : > { %v507_v33 = vpop.xlane.xlu0 %506  ;;  %541 = vperm.xlu2 %950, %v968_v31  }
 0x215   : > { %v513_v34 = vadd.f32 %v507_v33, %v493_v32 }
 0x217   : > { %518 = vst.msk [vmem:[#allocation3 + $0x10] sm:$0xff] %vm311_vm1, %v513_v34 }
 0x21e   : > { %v646_v35 = vld [vmem:[#allocation3 + $0x10] sm:$0xff] }
 0x21f   : > { %969 = vrcp.f32 %v646_v35 }
 0x221   : > { %v606_v36 = vpop.f32.mrf.mxu2 }
 0x225   : > { %v970_v38 = vpop.eup %969 }
 0x226   : > { %v501_v43 = vpop.xlane.xlu2 %500  ;;  %668 = vperm.xlu1 %952, %v970_v38  }
 0x227   : > { %v511_v44 = vadd.f32 %v501_v43, %v491_v40 }
 0x229   : > { %516 = vst.msk [vmem:[#allocation3] sm:$0xff] %vm311_vm1, %v511_v44  ;;  %v608_v39 = vpop.f32.mrf.mxu2  ;;  %v625_v41 = vpop.f32.mrf.mxu3 }
 0x22d   : > { %v568_v46 = vpop.f32.mrf.mxu0 }
 0x22e   : > { %v504_v48 = vpop.xlane.xlu1 %503  ;;  %v527_v49 = vpop.permute.xlu2 %526 }
 0x22f   : > { %v512_v50 = vadd.f32 %v504_v48, %v492_v47  ;;  %v544_v51 = vmul.f32 %v527_v49, %v520_v45 }
 0x230   : > { %v644_v52 = vld [vmem:[#allocation3] sm:$0xff] }
 0x231   : > { %517 = vst.msk [vmem:[#allocation3 + $0x8] sm:$0xff] %vm311_vm1, %v512_v50  ;;  %v629_v53 = vadd.f32 %v568_v46, %v544_v51  ;;  %v627_v54 = vpop.f32.mrf.mxu3  ;;  %971 = vrcp.f32 %v644_v52 }
 0x233   : > { %633 = vst.msk [vmem:[#allocation4] sm:$0xff] %vm320_vm0, %v629_v53 }
 0x235   : > { %v570_v56 = vpop.f32.mrf.mxu0  ;;  %v587_v57 = vpop.f32.mrf.mxu1 }
 0x236   : > { %v537_v58 = vpop.permute.xlu2 %536 }
 0x237   : > { %v972_v59 = vpop.eup %971  ;;  %v546_v60 = vmul.f32 %v537_v58, %v522_v55 }
 0x238   : > { %658 = vperm.xlu0 %951, %v972_v59   ;;  %v645_v61 = vld [vmem:[#allocation3 + $0x8] sm:$0xff] }
 0x239   : > { %v631_v62 = vadd.f32 %v606_v36, %v546_v60  ;;  %973 = vrcp.f32 %v645_v61 }
 0x23a   : > { %v652_v15 = vld [vmem:[#allocation4] sm:$0xff] }
 0x23b   : > { %635 = vst.msk [vmem:[#allocation4 + $0x10] sm:$0xff] %vm320_vm0, %v631_v62 }
 0x23d   : > { %v589_v63 = vpop.f32.mrf.mxu1 }
 0x23f   : > { %v974_v0 = vpop.eup %973 }
 0x240   : > { %663 = vperm.xlu2 %950, %v974_v0  }
 0x242   : > { %v654_v17 = vld [vmem:[#allocation4 + $0x10] sm:$0xff] }
 0x246   : > { %v532_v2 = vpop.permute.xlu1 %531 }
 0x247   : > { %v545_v3 = vmul.f32 %v532_v2, %v521_v1 }
 0x249   : > { %v630_v4 = vadd.f32 %v587_v57, %v545_v3 }
 0x24b   : > { %634 = vst.msk [vmem:[#allocation4 + $0x8] sm:$0xff] %vm320_vm0, %v630_v4 }
 0x252   : > { %v653_v19 = vld [vmem:[#allocation4 + $0x8] sm:$0xff] }
 0x26f   : > { %v510_v7 = vpop.xlane.xlu2 %509 }
 0x270   : > { %v514_v8 = vadd.f32 %v510_v7, %v494_v6 }
 0x272   : > { %519 = vst.msk [vmem:[#allocation3 + $0x18] sm:$0xff] %vm311_vm1, %v514_v8 }
 0x277   : > { %v542_v10 = vpop.permute.xlu2 %541 }
 0x278   : > { %v547_v11 = vmul.f32 %v542_v10, %v523_v9 }
 0x279   : > { %v647_v12 = vld [vmem:[#allocation3 + $0x18] sm:$0xff] }
 0x27a   : > { %v632_v14 = vadd.f32 %v625_v41, %v547_v11  ;;  %975 = vrcp.f32 %v647_v12 }
 0x27c   : > { %636 = vst.msk [vmem:[#allocation4 + $0x18] sm:$0xff] %vm320_vm0, %v632_v14 }
 0x280   : > { %v976_v16 = vpop.eup %975 }
 0x281   : > { %673 = vperm.xlu2 %950, %v976_v16  }
 0x283   : > { %v655_v24 = vld [vmem:[#allocation4 + $0x18] sm:$0xff] }
 0x298   : > { %v669_v13 = vpop.permute.xlu1 %668 }
 0x299   : > { %v678_v18 = vmul.f32 %v669_v13, %v654_v17 }
 0x29a   : > { %v664_v20 = vpop.permute.xlu2 %663 }
 0x29b   : > { %682 = vst.msk [vmem:[%s301_s29 + $0x10] sm:$0xff] %vm320_vm0, %v678_v18  ;;  %v677_v21 = vmul.f32 %v664_v20, %v653_v19 }
 0x29d   : > { %681 = vst.msk [vmem:[%s301_s29 + $0x8] sm:$0xff] %vm320_vm0, %v677_v21 }
 0x2aa   : > { %v659_v22 = vpop.permute.xlu0 %658 }
 0x2ab   : > { %v676_v23 = vmul.f32 %v659_v22, %v652_v15 }
 0x2ad   : > { %680 = vst.msk [vmem:[%s301_s29] sm:$0xff] %vm320_vm0, %v676_v23 }
 0x2db   : > { %v674_v25 = vpop.permute.xlu2 %673 }
 0x2dc   : > { %v679_v26 = vmul.f32 %v674_v25, %v655_v24 }
 0x2de   : > { %683 = vst.msk [vmem:[%s301_s29 + $0x18] sm:$0xff] %vm320_vm0, %v679_v26 }
 0x2df   : > { %1094 = shalt.err (!%p1091_p13)
}
 0x2e0   : > { %s1160_s1 = smov 128   ;;  %s1161_s20 = smov 8  }
 0x2e1   : > { %877 = dma.vmem_to_hbm [thread:$0]  (%p1237_p9), %s699_s22, 512, %s701_s23, %s685_s6, %s1160_s1, %s1160_s1, %s1161_s20  }
 0x2e2 PF: > { %s1479_s28 = sld [smem:[#allocation17_spill]]  ;;  %s715_s16 = sand.u32 1, %s1133_s12  }
 0x2e3   : > { %p890_p0 = pnand %p839_p12, %p1244_p11  ;;  %s716_s14 = scalar_lea.sflag [#allocation7], %s715_s16 }
 0x2e5   : > { %p891_p1 = pneg %p890_p0 }
 0x2e7   : > { %1128 = dma.done.wait (%p891_p1), %s716_s14, 512  }
 0x2e8   : > { %1130 = vsyncadd (%p891_p1), %s716_s14, 4294966784  ;;  %s22_s17 = sadd.s32 1, %s1479_s28   ;;  %s1480_s26 = sld [smem:[#allocation15_spill]] }
 0x2e9   : > { %p19_p2 = scmp.ge.s32.totalorder %s22_s17, 4   ;;  %s1481_s14 = sld [smem:[#allocation19_spill]] }
 0x2ea   : > { %s1482_s15 = sld [smem:[#allocation16_spill]]  ;;  %s1484_s12 = smov %s1137_s13 }
 0x2eb   : > { %s1483_s16 = sld [smem:[#allocation18_spill]]  ;;  %21 = sbr.rel (!%p19_p2) target bundleno = 10 (0xa), region = 109 }
 0x2ee   : > { %s1485_s13 = smov %s1480_s26 }
 0x2f0   :  { %722 = vsyncpa [#allocation6], 1 }
 0x2f1   :  { %724 = vsyncpa [#allocation6 + $0x1], 1 }
 0x2f2   :  { %725 = vsyncpa [#allocation9], 1 }
 0x2f3   :  { %727 = vsyncpa [#allocation9 + $0x1], 1 }
 0x2f4   :  { %728 = vsyncpa [#allocation7], 1 }
 0x2f5   :  { %730 = vsyncpa [#allocation7 + $0x1], 1 }

</bundles_post_ra>
